<compile_context>
chip_gen: v6e
topology: v6e:2x2x1
jax: 0.10.0
libtpu: 0.0.40
codegen_flags: <defaults>
</compile_context>

<pallas_src>
import jax
import jax.numpy as jnp
from jax import lax
from jax.experimental import pallas as pl
from jax.experimental.pallas import tpu as pltpu

MAX_NORM = 1.0
EPS = 1e-7  # torch.embedding_renorm_ eps (used by the reference only)


def user_embed_kernel(idx_ref, g_tbl_ref, a_tbl_ref, o_tbl_ref, z_tbl_ref,
                      out_ref):
    """idx_ref: (B, 4) int32 packed [gender, age, occupation, area] ids.
    *_tbl_ref: (V_t, D) float32 embedding tables.
    out_ref:   (B, 4*D) float32, written with a single lane-dense store."""
    B = idx_ref.shape[0]
    tables = (g_tbl_ref, a_tbl_ref, o_tbl_ref, z_tbl_ref)
    v_max = max(t.shape[0] for t in tables)

    # One shared iota, sliced per table (iota/broadcast is not CSE'd by JAX).
    iota = lax.broadcasted_iota(jnp.int32, (B, v_max), 1)

    embs = []
    for t, tbl_ref in enumerate(tables):
        v = tbl_ref.shape[0]
        # One-hot row selector; in-range indices assumed (torch would raise
        # on OOB, here an OOB index yields an all-zero row).
        onehot = (idx_ref[:, t:t + 1] == iota[:, :v]).astype(jnp.float32)
        # Gather as a tiny MXU matmul: (B, V) @ (V, D) -> (B, D).
        emb = jnp.dot(onehot, tbl_ref[...], preferred_element_type=jnp.float32)
        # max_norm=1.0 renorm applied to the gathered rows only:
        # rows with ||row|| > MAX_NORM are scaled back to MAX_NORM.
        sumsq = jnp.sum(emb * emb, axis=1, keepdims=True)            # (B, 1)
        scale = jnp.where(sumsq > MAX_NORM * MAX_NORM,
                          MAX_NORM * lax.rsqrt(sumsq),
                          jnp.ones_like(sumsq))
        embs.append(emb * scale)

    # Single unmasked 128-lane store (matches PyTorch cat along dim=1).
    out_ref[...] = jnp.concatenate(embs, axis=1).astype(out_ref.dtype)


def user_forward(gender_idx, age_idx, occupation_idx, area_idx,
                 w_gender, w_age, w_occ, w_area):
    """Pallas equivalent of user.forward: returns (B, 4*embedding_dim)."""
    B = gender_idx.shape[0]
    D = w_gender.shape[1]

    # Pack the four index vectors into one (B, 4) int32 array: 1 input DMA
    # instead of 4 padded (B, 1) VMEM buffers.
    idx = jnp.stack([gender_idx.astype(jnp.int32),
                     age_idx.astype(jnp.int32),
                     occupation_idx.astype(jnp.int32),
                     area_idx.astype(jnp.int32)], axis=1)

    vmem = pl.BlockSpec(memory_space=pltpu.MemorySpace.VMEM)
    return pl.pallas_call(
        user_embed_kernel,
        out_shape=jax.ShapeDtypeStruct((B, 4 * D), w_gender.dtype),
        in_specs=[vmem] * 5,
        out_specs=vmem,
        # TODO(synk): if batch/vocab ever grow, add a grid over B with
        # dimension_semantics=("parallel",) and an explicit vmem_limit_bytes
        # (v7x: 64 MiB physical VMEM, 2 TensorCores per chip).
    )(idx, w_gender, w_age, w_occ, w_area)


def reference_forward(gender_idx, age_idx, occupation_idx, area_idx,
                      w_gender, w_age, w_occ, w_area):
    """Pure-JAX ground truth (torch-faithful max_norm renorm with +eps)."""
    def emb(idx, w):
        norms = jnp.sqrt(jnp.sum(w * w, axis=1, keepdims=True))
        scale = jnp.where(norms > MAX_NORM, MAX_NORM / (norms + EPS), 1.0)
        return (w * scale)[idx]
    return jnp.concatenate([emb(gender_idx, w_gender), emb(age_idx, w_age),
                            emb(occupation_idx, w_occ), emb(area_idx, w_area)],
                           axis=1)


if __name__ == "__main__":
    # Config consistent with the module's __init__ (small shapes).
    num_gender, num_age, num_occupation, num_zipcode = 2, 7, 21, 30
    embedding_dim = 32
    batch = 8

    key = jax.random.PRNGKey(0)
    k1, k2, k3, k4, k5, k6, k7, k8 = jax.random.split(key, 8)

    # torch.nn.Embedding default init is N(0, 1).
    w_gender = jax.random.normal(k1, (num_gender, embedding_dim), jnp.float32)
    w_age = jax.random.normal(k2, (num_age, embedding_dim), jnp.float32)
    w_occ = jax.random.normal(k3, (num_occupation, embedding_dim), jnp.float32)
    w_area = jax.random.normal(k4, (num_zipcode, embedding_dim), jnp.float32)

    gender_idx = jax.random.randint(k5, (batch,), 0, num_gender, jnp.int32)
    age_idx = jax.random.randint(k6, (batch,), 0, num_age, jnp.int32)
    occupation_idx = jax.random.randint(k7, (batch,), 0, num_occupation, jnp.int32)
    area_idx = jax.random.randint(k8, (batch,), 0, num_zipcode, jnp.int32)

    out = user_forward(gender_idx, age_idx, occupation_idx, area_idx,
                       w_gender, w_age, w_occ, w_area)
    out = jax.block_until_ready(out)

    ref = reference_forward(gender_idx, age_idx, occupation_idx, area_idx,
                            w_gender, w_age, w_occ, w_area)
    assert out.shape == (batch, 4 * embedding_dim)
    # Slightly loosened vs 1e-5: kernel uses rsqrt (no torch +eps term).
    assert jnp.allclose(out, ref, atol=1e-4, rtol=1e-4)
    print("KERNEL_OK")
</pallas_src>

<mosaic_0001>
module attributes {stable_mosaic.version = 11 : i64} {
  func.func @user_embed_kernel(%arg0: memref<8x4xi32, #tpu.memory_space<vmem>>, %arg1: memref<2x32xf32, #tpu.memory_space<vmem>>, %arg2: memref<7x32xf32, #tpu.memory_space<vmem>>, %arg3: memref<21x32xf32, #tpu.memory_space<vmem>>, %arg4: memref<30x32xf32, #tpu.memory_space<vmem>>, %arg5: memref<8x128xf32, #tpu.memory_space<vmem>>) attributes {dimension_semantics = [], scalar_prefetch = 0 : i64, scratch_operands = 0 : i64, tpu.core_type = #tpu.core_type<tc>} {
    %0 = tpu.iota {dimensions = array<i32: 1>} : vector<8x30xi32>
    %c0 = arith.constant 0 : index
    %c0_0 = arith.constant 0 : index
    %1 = vector.load %arg0[%c0, %c0_0] : memref<8x4xi32, #tpu.memory_space<vmem>>, vector<8x1xi32>
    %2 = vector.extract_strided_slice %0 {offsets = [0, 0], sizes = [8, 2], strides = [1, 1]} : vector<8x30xi32> to vector<8x2xi32>
    %3 = vector.broadcast %1 : vector<8x1xi32> to vector<8x2xi32>
    %4 = arith.cmpi eq, %3, %2 : vector<8x2xi32>
    %5 = arith.extui %4 : vector<8x2xi1> to vector<8x2xi32>
    %6 = arith.sitofp %5 : vector<8x2xi32> to vector<8x2xf32>
    %c0_1 = arith.constant 0 : index
    %c0_2 = arith.constant 0 : index
    %7 = vector.load %arg1[%c0_1, %c0_2] : memref<2x32xf32, #tpu.memory_space<vmem>>, vector<2x32xf32>
    %cst = arith.constant dense<0.000000e+00> : vector<8x32xf32>
    %8 = tpu.matmul %6, %7, %cst {dimension_numbers = #tpu.dot_dimension_numbers<[1], [0], [0], [1], [0, 0, 1, 1], [], []>} : vector<8x2xf32>, vector<2x32xf32>, vector<8x32xf32> -> vector<8x32xf32>
    %9 = arith.mulf %8, %8 : vector<8x32xf32>
    %cst_3 = arith.constant dense<0.000000e+00> : vector<8xf32>
    %10 = vector.multi_reduction <add>, %9, %cst_3 [1] : vector<8x32xf32> to vector<8xf32>
    %11 = vector.shape_cast %10 : vector<8xf32> to vector<8x1xf32>
    %cst_4 = arith.constant 1.000000e+00 : f32
    %12 = vector.broadcast %cst_4 : f32 to vector<8x1xf32>
    %13 = arith.cmpf ogt, %11, %12 : vector<8x1xf32>
    %14 = math.rsqrt %11 : vector<8x1xf32>
    %cst_5 = arith.constant 1.000000e+00 : f32
    %15 = vector.broadcast %cst_5 : f32 to vector<8x1xf32>
    %16 = arith.mulf %15, %14 : vector<8x1xf32>
    %cst_6 = arith.constant 1.000000e+00 : f32
    %17 = vector.broadcast %cst_6 : f32 to vector<8x1xf32>
    %18 = arith.select %13, %16, %17 : vector<8x1xi1>, vector<8x1xf32>
    %19 = vector.broadcast %18 : vector<8x1xf32> to vector<8x32xf32>
    %20 = arith.mulf %8, %19 : vector<8x32xf32>
    %c0_7 = arith.constant 0 : index
    %c1 = arith.constant 1 : index
    %21 = vector.load %arg0[%c0_7, %c1] : memref<8x4xi32, #tpu.memory_space<vmem>>, vector<8x1xi32>
    %22 = vector.extract_strided_slice %0 {offsets = [0, 0], sizes = [8, 7], strides = [1, 1]} : vector<8x30xi32> to vector<8x7xi32>
    %23 = vector.broadcast %21 : vector<8x1xi32> to vector<8x7xi32>
    %24 = arith.cmpi eq, %23, %22 : vector<8x7xi32>
    %25 = arith.extui %24 : vector<8x7xi1> to vector<8x7xi32>
    %26 = arith.sitofp %25 : vector<8x7xi32> to vector<8x7xf32>
    %c0_8 = arith.constant 0 : index
    %c0_9 = arith.constant 0 : index
    %27 = vector.load %arg2[%c0_8, %c0_9] : memref<7x32xf32, #tpu.memory_space<vmem>>, vector<7x32xf32>
    %cst_10 = arith.constant dense<0.000000e+00> : vector<8x32xf32>
    %28 = tpu.matmul %26, %27, %cst_10 {dimension_numbers = #tpu.dot_dimension_numbers<[1], [0], [0], [1], [0, 0, 1, 1], [], []>} : vector<8x7xf32>, vector<7x32xf32>, vector<8x32xf32> -> vector<8x32xf32>
    %29 = arith.mulf %28, %28 : vector<8x32xf32>
    %cst_11 = arith.constant dense<0.000000e+00> : vector<8xf32>
    %30 = vector.multi_reduction <add>, %29, %cst_11 [1] : vector<8x32xf32> to vector<8xf32>
    %31 = vector.shape_cast %30 : vector<8xf32> to vector<8x1xf32>
    %cst_12 = arith.constant 1.000000e+00 : f32
    %32 = vector.broadcast %cst_12 : f32 to vector<8x1xf32>
    %33 = arith.cmpf ogt, %31, %32 : vector<8x1xf32>
    %34 = math.rsqrt %31 : vector<8x1xf32>
    %cst_13 = arith.constant 1.000000e+00 : f32
    %35 = vector.broadcast %cst_13 : f32 to vector<8x1xf32>
    %36 = arith.mulf %35, %34 : vector<8x1xf32>
    %cst_14 = arith.constant 1.000000e+00 : f32
    %37 = vector.broadcast %cst_14 : f32 to vector<8x1xf32>
    %38 = arith.select %33, %36, %37 : vector<8x1xi1>, vector<8x1xf32>
    %39 = vector.broadcast %38 : vector<8x1xf32> to vector<8x32xf32>
    %40 = arith.mulf %28, %39 : vector<8x32xf32>
    %c0_15 = arith.constant 0 : index
    %c2 = arith.constant 2 : index
    %41 = vector.load %arg0[%c0_15, %c2] : memref<8x4xi32, #tpu.memory_space<vmem>>, vector<8x1xi32>
    %42 = vector.extract_strided_slice %0 {offsets = [0, 0], sizes = [8, 21], strides = [1, 1]} : vector<8x30xi32> to vector<8x21xi32>
    %43 = vector.broadcast %41 : vector<8x1xi32> to vector<8x21xi32>
    %44 = arith.cmpi eq, %43, %42 : vector<8x21xi32>
    %45 = arith.extui %44 : vector<8x21xi1> to vector<8x21xi32>
    %46 = arith.sitofp %45 : vector<8x21xi32> to vector<8x21xf32>
    %c0_16 = arith.constant 0 : index
    %c0_17 = arith.constant 0 : index
    %47 = vector.load %arg3[%c0_16, %c0_17] : memref<21x32xf32, #tpu.memory_space<vmem>>, vector<21x32xf32>
    %cst_18 = arith.constant dense<0.000000e+00> : vector<8x32xf32>
    %48 = tpu.matmul %46, %47, %cst_18 {dimension_numbers = #tpu.dot_dimension_numbers<[1], [0], [0], [1], [0, 0, 1, 1], [], []>} : vector<8x21xf32>, vector<21x32xf32>, vector<8x32xf32> -> vector<8x32xf32>
    %49 = arith.mulf %48, %48 : vector<8x32xf32>
    %cst_19 = arith.constant dense<0.000000e+00> : vector<8xf32>
    %50 = vector.multi_reduction <add>, %49, %cst_19 [1] : vector<8x32xf32> to vector<8xf32>
    %51 = vector.shape_cast %50 : vector<8xf32> to vector<8x1xf32>
    %cst_20 = arith.constant 1.000000e+00 : f32
    %52 = vector.broadcast %cst_20 : f32 to vector<8x1xf32>
    %53 = arith.cmpf ogt, %51, %52 : vector<8x1xf32>
    %54 = math.rsqrt %51 : vector<8x1xf32>
    %cst_21 = arith.constant 1.000000e+00 : f32
    %55 = vector.broadcast %cst_21 : f32 to vector<8x1xf32>
    %56 = arith.mulf %55, %54 : vector<8x1xf32>
    %cst_22 = arith.constant 1.000000e+00 : f32
    %57 = vector.broadcast %cst_22 : f32 to vector<8x1xf32>
    %58 = arith.select %53, %56, %57 : vector<8x1xi1>, vector<8x1xf32>
    %59 = vector.broadcast %58 : vector<8x1xf32> to vector<8x32xf32>
    %60 = arith.mulf %48, %59 : vector<8x32xf32>
    %c0_23 = arith.constant 0 : index
    %c3 = arith.constant 3 : index
    %61 = vector.load %arg0[%c0_23, %c3] : memref<8x4xi32, #tpu.memory_space<vmem>>, vector<8x1xi32>
    %62 = vector.broadcast %61 : vector<8x1xi32> to vector<8x30xi32>
    %63 = arith.cmpi eq, %62, %0 : vector<8x30xi32>
    %64 = arith.extui %63 : vector<8x30xi1> to vector<8x30xi32>
    %65 = arith.sitofp %64 : vector<8x30xi32> to vector<8x30xf32>
    %c0_24 = arith.constant 0 : index
    %c0_25 = arith.constant 0 : index
    %66 = vector.load %arg4[%c0_24, %c0_25] : memref<30x32xf32, #tpu.memory_space<vmem>>, vector<30x32xf32>
    %cst_26 = arith.constant dense<0.000000e+00> : vector<8x32xf32>
    %67 = tpu.matmul %65, %66, %cst_26 {dimension_numbers = #tpu.dot_dimension_numbers<[1], [0], [0], [1], [0, 0, 1, 1], [], []>} : vector<8x30xf32>, vector<30x32xf32>, vector<8x32xf32> -> vector<8x32xf32>
    %68 = arith.mulf %67, %67 : vector<8x32xf32>
    %cst_27 = arith.constant dense<0.000000e+00> : vector<8xf32>
    %69 = vector.multi_reduction <add>, %68, %cst_27 [1] : vector<8x32xf32> to vector<8xf32>
    %70 = vector.shape_cast %69 : vector<8xf32> to vector<8x1xf32>
    %cst_28 = arith.constant 1.000000e+00 : f32
    %71 = vector.broadcast %cst_28 : f32 to vector<8x1xf32>
    %72 = arith.cmpf ogt, %70, %71 : vector<8x1xf32>
    %73 = math.rsqrt %70 : vector<8x1xf32>
    %cst_29 = arith.constant 1.000000e+00 : f32
    %74 = vector.broadcast %cst_29 : f32 to vector<8x1xf32>
    %75 = arith.mulf %74, %73 : vector<8x1xf32>
    %cst_30 = arith.constant 1.000000e+00 : f32
    %76 = vector.broadcast %cst_30 : f32 to vector<8x1xf32>
    %77 = arith.select %72, %75, %76 : vector<8x1xi1>, vector<8x1xf32>
    %78 = vector.broadcast %77 : vector<8x1xf32> to vector<8x32xf32>
    %79 = arith.mulf %67, %78 : vector<8x32xf32>
    %80 = tpu.concatenate %20, %40, %60, %79 in 1 : vector<8x32xf32>, vector<8x32xf32>, vector<8x32xf32>, vector<8x32xf32> -> vector<8x128xf32>
    %c0_31 = arith.constant 0 : index
    %c0_32 = arith.constant 0 : index
    %81 = vector.load %arg5[%c0_31, %c0_32] : memref<8x128xf32, #tpu.memory_space<vmem>>, vector<8x128xf32>
    tpu.vector_store %arg5[%c0_31, %c0_32], %80 {strides = array<i32>} : memref<8x128xf32, #tpu.memory_space<vmem>>, vector<8x128xf32>,
    return
  }
}

</mosaic_0001>

<bundles_post_ra>
// kernel: tpu_custom_call.1
= control target key start
LH: loop header
LB: loop body
LE: loop exit
PB: predicated region body
PF: predicated region fallthrough
CT: control target
= control target key end

     0   :  { %10 = vsyncpa [#allocation3], 0  ;;  %s700_s0 = inlined_call_operand.vmem [shape: s32[8,4], index: 0, kind: input, shape index: {}]   ;;  %s701_s1 = inlined_call_operand.vmem [shape: f32[2,32], index: 1, kind: input, shape index: {}]   ;;  %s702_s2 = inlined_call_operand.vmem [shape: f32[7,32], index: 2, kind: input, shape index: {}]   ;;  %s703_s3 = inlined_call_operand.hbm [shape: f32[21,32], index: 3, kind: input, shape index: {}]   ;;  %s704_s4 = inlined_call_operand.hbm [shape: f32[30,32], index: 4, kind: input, shape index: {}]   ;;  %s705_s5 = inlined_call_operand.hbm [shape: f32[8,128], index: 5, kind: output, shape index: {}]  }
   0x1   :  { %11 = vsyncpa [#allocation6], 0 }
   0x2   :  { %12 = vsyncpa [#allocation4], 0  ;;  %s612_s18 = smov [#allocation2]  }
   0x3   :  { %s24_s19 = sshll.u32 %s612_s18, 4  ;;  %s25_s19 = int_to_ptr.vmem [resolvable:$true] %s24_s19 }
   0x4   :  { %s554_s20 = scalar_lea.vmem %s25_s19, 384  ;;  %p559_p1 = scmp.lt.s32.totalorder %s25_s19, %s25_s19 }
   0x5   :  { %p555_p0 = scmp.ne.s32.totalorder %s25_s19, %s554_s20  ;;  %p560_p2 = scmp.lt.s32.totalorder %s554_s20, %s554_s20 }
   0x7   :  { %p561_p3 = por %p560_p2, %p559_p1 }
   0x9   :  { %p562_p4 = pnand %p561_p3, %p555_p0 }
   0xb   :  { %565 = shalt.err (!%p562_p4)
}
   0xc   :  { %s613_s21 = smov 128   ;;  %s614_s22 = smov 8  }
   0xd   :  { %30 = dma.hbm_to_vmem [thread:$0]  %s703_s3, 384, %s25_s19, [#allocation3], %s613_s21, %s613_s21, %s614_s22  }
   0xe   :  { %s615_s25 = smov [#allocation5]  }
   0xf   :  { %s36_s26 = sshll.u32 %s615_s25, 4  ;;  %s37_s26 = int_to_ptr.vmem [resolvable:$true] %s36_s26 }
  0x10   :  { %s574_s27 = scalar_lea.vmem %s37_s26, 512  ;;  %p579_p6 = scmp.lt.s32.totalorder %s37_s26, %s37_s26 }
  0x11   :  { %p575_p5 = scmp.ne.s32.totalorder %s37_s26, %s574_s27  ;;  %p580_p7 = scmp.lt.s32.totalorder %s574_s27, %s574_s27 }
  0x13   :  { %p581_p8 = por %p580_p7, %p579_p6 }
  0x15   :  { %p582_p9 = pnand %p581_p8, %p575_p5 }
  0x17   :  { %585 = shalt.err (!%p582_p9)
}
  0x18   :  { %42 = dma.hbm_to_vmem [thread:$0]  %s704_s4, 512, %s37_s26, [#allocation6], %s613_s21, %s613_s21, %s614_s22  }
  0x19   :  { %606 = dma.done.wait [#allocation3], 384  }
  0x1a   :  { %607 = vsyncadd [#allocation3], 4294966912 }
  0x1b   :  { %608 = dma.done.wait [#allocation6], 512  }
  0x1c   :  { %609 = vsyncadd [#allocation6], 4294966784  ;;  %v616_v0 = vmov 1   ;;  %v617_v1 = vmov 2   ;;  %v618_v2 = vmov 0.0   ;;  %vm619_vm0 = vmmov 0  }
  0x1d   :  { %533 = vset.pattern.permute.xlu0 %v616_v0  ;;  %535 = vset.pattern.permute.xlu1 %v617_v1  ;;  %vm157_vm1 = vcmask 1046528   ;;  %v51_v3 = vld [vmem:[%s700_s0] sm:$0xff]  ;;  %vm63_vm2 = vcmask 1041408   ;;  %v620_v6 = vmov 0   ;;  %v621_v7 = vmov 3   ;;  %v342_v14 = vld [vmem:[#allocation5 + $0x10] sm:$0xff] }
  0x1e   :  { %494 = vmatprep.subr.mxu1 %v618_v2  ;;  %489 = vmatprep.subr.mxu0 %v618_v2  ;;  %v152_v4 = vld [vmem:[%s702_s2] sm:$0x7f]  ;;  %v49_v8 = vlaneseq  ;;  %vm153_vm3 = vcmask 56320   ;;  %v343_v12 = vld [vmem:[#allocation5 + $0x18] sm:$0x3f]  ;;  %vm348_vm5 = vcmask 1045504  }
  0x1f   :  { %496 = vmatprep.mubr.msk.f32.mxu1 %vm619_vm0, %v618_v2  ;;  %491 = vmatprep.mubr.msk.f32.mxu0 %vm619_vm0, %v618_v2  ;;  %v58_v5 = vld [vmem:[%s701_s1] sm:$0x3]  ;;  %vm59_vm6 = vcmask 15360   ;;  %v247_v18 = vld [vmem:[#allocation2 + $0x10] sm:$0x1f]  ;;  %vm252_vm8 = vcmask 1044480  }
  0x20   :  { %147 = vperm.xlu0 %533, %v51_v3   ;;  %240 = vperm.xlu1 %535, %v51_v3   ;;  %v50_v9 = vand.u32 127, %v49_v8  ;;  %v341_v17 = vld [vmem:[#allocation5 + $0x8] sm:$0xff]  ;;  %v246_v20 = vld [vmem:[#allocation2 + $0x8] sm:$0xff]  ;;  %v340_v21 = vld [vmem:[#allocation5] sm:$0xff]  ;;  %vm344_vm11 = vcmask 244736   ;;  %vm248_vm12 = vcmask 171008  }
  0x21   :  { %495 = vmatpush3.msk.msra.mxu1 %vm157_vm1, %v152_v4  ;;  %490 = vmatpush3.msk.msra.mxu0 %vm63_vm2, %v58_v5  ;;  %v245_v23 = vld [vmem:[#allocation2] sm:$0xff]  ;;  %vm138_vm13 = vcmask 261120   ;;  %s622_s0 = smov 32   ;;  %s623_s1 = smov 64   ;;  %vm443_vm2 = vcmask 523264  }
  0x22   :  { %499 = vmatprep.subr.mxu0 %v618_v2  ;;  %508 = vmatprep.subr.mxu1 %v618_v2  ;;  %s624_s2 = smov 96   ;;  %s625_s9 = smov [#allocation7]  }
  0x23   :  { %s454_s10 = sshll.u32 %s625_s9, 4  ;;  %s455_s10 = int_to_ptr.vmem [resolvable:$true] %s454_s10 }
  0x24   :  { %534 = vset.pattern.permute.xlu0 %v620_v6  ;;  %536 = vset.pattern.permute.xlu1 %v621_v7  ;;  %s586_s11 = scalar_lea.vmem %s455_s10, 128  ;;  %p591_p11 = scmp.lt.s32.totalorder %s455_s10, %s455_s10 }
  0x25   :  { %53 = vperm.xlu0 %534, %v51_v3   ;;  %335 = vperm.xlu1 %536, %v51_v3   ;;  %p587_p10 = scmp.ne.s32.totalorder %s455_s10, %s586_s11  ;;  %p592_p12 = scmp.lt.s32.totalorder %s586_s11, %s586_s11 }
  0x27   :  { %p593_p13 = por %p592_p12, %p591_p11 }
  0x29   :  { %537 = vset.pattern.permute.xlu0 %v621_v7  ;;  %p594_p0 = pnand %p593_p13, %p587_p10 }
  0x9b   :  { %v148_v10 = vpop.permute.xlu0 %147  ;;  %v241_v11 = vpop.permute.xlu1 %240 }
  0x9c   :  { %vm149_vm4 = vcmp.eq.s32.totalorder %v148_v10, %v50_v9  ;;  %vm242_vm10 = vcmp.eq.s32.totalorder %v241_v11, %v50_v9 }
  0x9d   :  { %v467_v13 = vsel %vm149_vm4, 1.0, %v618_v2  ;;  %v470_v24 = vsel %vm242_vm10, 1.0, %v618_v2 }
  0x9e   :  { %497 = vmatmul.mubr.msk.f32.vlgmr.msra.gmra.mxu1 %vm153_vm3, %v467_v13  ;;  %vm445_vm3 = vcmask 785408  }
  0x9f   :  { %509 = vmatpush3.msk.msra.mxu1 %vm348_vm5, %v343_v12  ;;  %516 = vmatprep.mubr.msk.f32.mxu1 %vm619_vm0, %v618_v2 }
  0xa0   :  { %v54_v15 = vpop.permute.xlu0 %53  ;;  %510 = vmatprep.subr.mxu1 %v618_v2  ;;  %v336_v16 = vpop.permute.xlu1 %335 }
  0xa1   :  { %vm55_vm7 = vcmp.eq.s32.totalorder %v54_v15, %v50_v9  ;;  %511 = vmatpush3.msra.mxu1 %v342_v14  ;;  %vm337_vm9 = vcmp.eq.s32.totalorder %v336_v16, %v50_v9 }
  0xa2   :  { %v464_v19 = vsel %vm55_vm7, 1.0, %v618_v2  ;;  %512 = vmatprep.subr.mxu1 %v618_v2  ;;  %v473_v22 = vsel %vm337_vm9, 1.0, %v618_v2 }
  0xa3   :  { %492 = vmatmul.mubr.msk.f32.vlgmr.msra.gmra.mxu0 %vm59_vm6, %v464_v19  ;;  %513 = vmatpush3.msra.mxu1 %v341_v17 }
  0xa4   :  { %500 = vmatpush3.msk.msra.mxu0 %vm252_vm8, %v247_v18  ;;  %505 = vmatprep.mubr.msk.f32.mxu0 %vm619_vm0, %v618_v2 }
  0xa5   :  { %501 = vmatprep.subr.mxu0 %v618_v2  ;;  %514 = vmatprep.subr.mxu1 %v618_v2 }
  0xa6   :  { %502 = vmatpush3.msra.mxu0 %v246_v20  ;;  %515 = vmatpush3.msra.mxu1 %v340_v21 }
  0xa7   :  { %503 = vmatprep.subr.mxu0 %v618_v2  ;;  %517 = vmatmul.mubr.msk.f32.vlgmr.msra.gmra.mxu1 %vm344_vm11, %v473_v22 }
  0xa8   :  { %504 = vmatpush3.msra.mxu0 %v245_v23 }
  0xa9   :  { %506 = vmatmul.mubr.msk.f32.vlgmr.msra.gmra.mxu0 %vm248_vm12, %v470_v24 }
 0x15e   :  { %v227_v25 = vpop.f32.mrf.mxu1 }
 0x15f   :  { %v231_v26 = vmul.f32 %v227_v25, %v227_v25 }
 0x160   :  { %v498_v27 = vpop.f32.mrf.mxu1 }
 0x161   :  { %v232_v28 = vsel %vm138_vm13, %v231_v26, 0.0 }
 0x162   :  { %233 = vadd.xlane.f32.xlu1 %v232_v28 }
 0x163   :  { %v133_v29 = vpop.f32.mrf.mxu0 }
 0x164   :  { %v137_v30 = vmul.f32 %v133_v29, %v133_v29 }
 0x165   :  { %v493_v31 = vpop.f32.mrf.mxu0 }
 0x166   :  { %v139_v32 = vsel %vm138_vm13, %v137_v30, 0.0 }
 0x167   :  { %140 = vadd.xlane.f32.xlu1 %v139_v32  ;;  %v418_v33 = vpop.f32.mrf.mxu1 }
 0x168   :  { %v422_v37 = vmul.f32 %v418_v33, %v418_v33 }
 0x169   :  { %v322_v34 = vpop.f32.mrf.mxu0  ;;  %v518_v35 = vpop.f32.mrf.mxu1 }
 0x16a   :  { %v326_v36 = vmul.f32 %v322_v34, %v322_v34  ;;  %v423_v40 = vsel %vm138_vm13, %v422_v37, 0.0 }
 0x16b   :  { %v507_v38 = vpop.f32.mrf.mxu0 }
 0x16c   :  { %v327_v39 = vsel %vm138_vm13, %v326_v36, 0.0 }
 0x16d   :  { %328 = vadd.xlane.f32.xlu0 %v327_v39 }
 0x171   :  { %424 = vadd.xlane.f32.xlu0 %v423_v40 }
 0x1eb   :  { %v234_v41 = vpop.xlane.xlu1 %233 }
 0x1ec   :  { %538 = vrsqrt.f32 %v234_v41  ;;  %vm235_vm14 = vcmp.gt.f32.partialorder %v234_v41, 1.0 }
 0x1f0   :  { %v141_v53 = vpop.xlane.xlu1 %140 }
 0x1f1   :  { %vm142_vm1 = vcmp.gt.f32.partialorder %v141_v53, 1.0 }
 0x1f6   :  { %v329_v42 = vpop.xlane.xlu0 %328 }
 0x1f7   :  { %540 = vrsqrt.f32 %v329_v42  ;;  %vm330_vm15 = vcmp.gt.f32.partialorder %v329_v42, 1.0 }
 0x1f9   :  { %v539_v43 = vpop.eup %538 }
 0x1fa   :  { %v237_v44 = vsel %vm235_vm14, %v539_v43, 1.0  ;;  %v425_v45 = vpop.xlane.xlu0 %424 }
 0x1fb   :  { %v238_v46 = vmul.f32 %v237_v44, %v227_v25  ;;  %542 = vrsqrt.f32 %v425_v45  ;;  %vm426_vm0 = vcmp.gt.f32.partialorder %v425_v45, 1.0 }
 0x1fc   :  { %544 = vrsqrt.f32 %v141_v53 }
 0x1fd   :  { %431 = vrot.lane.b32.xlu0 %v238_v46, %s622_s0 }
 0x204   :  { %v541_v47 = vpop.eup %540 }
 0x205   :  { %v332_v48 = vsel %vm330_vm15, %v541_v47, 1.0 }
 0x206   :  { %v333_v49 = vmul.f32 %v332_v48, %v322_v34 }
 0x208   :  { %v543_v50 = vpop.eup %542  ;;  %435 = vrot.lane.b32.xlu1 %v333_v49, %s623_s1 }
 0x209   :  { %v428_v51 = vsel %vm426_vm0, %v543_v50, 1.0  ;;  %v545_v54 = vpop.eup %544 }
 0x20a   :  { %v429_v52 = vmul.f32 %v428_v51, %v418_v33  ;;  %v144_v55 = vsel %vm142_vm1, %v545_v54, 1.0 }
 0x20b   :  { %v145_v58 = vmul.f32 %v144_v55, %v133_v29 }
 0x20c   :  { %439 = vrot.lane.b32.xlu1 %v429_v52, %s624_s2 }
 0x26f   :  { %v432_v56 = vpop.permute.xlu0 %431 }
 0x270   :  { %v442_v59 = vsel %vm138_vm13, %v145_v58, %v432_v56 }
 0x27a   :  { %v436_v57 = vpop.permute.xlu1 %435 }
 0x27b   :  { %v444_v60 = vsel %vm443_vm2, %v442_v59, %v436_v57 }
 0x27e   :  { %v440_v61 = vpop.permute.xlu1 %439 }
 0x27f   :  { %v446_v62 = vsel %vm445_vm3, %v444_v60, %v440_v61 }
 0x280   :  { %447 = vst [vmem:[#allocation7] sm:$0xff] %v446_v62 }
 0x281   :  { %597 = shalt.err (!%p594_p0)
}
 0x282   :  { %457 = dma.vmem_to_hbm [thread:$0]  %s455_s10, 128, %s705_s5, [#allocation4]  }
 0x283   :  { %610 = dma.done.wait [#allocation4], 128  }
 0x284   :  { %611 = vsyncadd [#allocation4], 4294967168 }
 0x285   :  { %461 = vsyncpa [#allocation3], 1 }
 0x286   :  { %462 = vsyncpa [#allocation6], 1 }
 0x287   :  { %463 = vsyncpa [#allocation4], 1 }

</bundles_post_ra>
